<compile_context>
chip_gen: v5e
topology: v5e:2x2
jax: 0.10.0
libtpu: 0.0.40
codegen_flags: <defaults>
</compile_context>

<pallas_src>
import jax
import jax.numpy as jnp
from jax import lax
from jax.experimental import pallas as pl
from jax.experimental.pallas import tpu as pltpu


# ------------------------- fused GAE forward kernel --------------------------
def gae_kernel(x_ref, adj_ref, wb_ref, wm_ref, o_ref):
    # x_ref  : (N_pad, D_in)    -- current graph's features (streamed per step)
    # adj_ref: (N_pad, N_pad)   -- resident (constant index_map)
    # wb_ref : (D_in, H1)       -- resident
    # wm_ref : (H1, H2)         -- resident
    # o_ref  : (N_pad, N_pad)   -- current graph's A_pred (lane-dense store)
    adj = adj_ref[...]

    # base_gcn: hidden = relu(adj @ (X @ W_base))
    h = jnp.dot(x_ref[...], wb_ref[...], preferred_element_type=jnp.float32)
    h = jnp.dot(adj, h, preferred_element_type=jnp.float32)
    h = jnp.maximum(h, 0.0)

    # gcn_mean: Z = adj @ (hidden @ W_mean)   (activation = identity)
    z = jnp.dot(h, wm_ref[...], preferred_element_type=jnp.float32)
    z = jnp.dot(adj, z, preferred_element_type=jnp.float32)

    # dot_product_decode: A_pred = sigmoid(Z @ Z.T)
    # contract the last dim of both operands -> MXU handles the "transpose".
    logits = lax.dot_general(
        z, z,
        dimension_numbers=(((1,), (1,)), ((), ())),
        preferred_element_type=jnp.float32,
    )
    # exact sigmoid: denominator >= 1, so result is guaranteed in [0, 1].
    o_ref[...] = pl.reciprocal(1.0 + jnp.exp(-logits), approx=False)


def gae_forward_batched(X, adj, W_base, W_mean):
    """X: (B, N, D_in) node features for B graphs sharing one adjacency.

    adj: (N, N), W_base: (D_in, H1), W_mean: (H1, H2).
    Returns A_pred: (B, N, N) float32.
    """
    B, N, D = X.shape
    H1 = W_base.shape[1]
    H2 = W_mean.shape[1]

    # Pad node dim to a multiple of 128 so the A_pred store is lane-dense
    # (unmasked vst) and adj / output blocks satisfy the (8, 128) constraint.
    n_pad = max(128, pl.cdiv(N, 128) * 128)
    Xp = jnp.pad(X, ((0, 0), (0, n_pad - N), (0, 0)))
    adjp = jnp.pad(adj, ((0, n_pad - N), (0, n_pad - N)))

    out = pl.pallas_call(
        gae_kernel,
        out_shape=jax.ShapeDtypeStruct((B, n_pad, n_pad), jnp.float32),
        grid_spec=pltpu.PrefetchScalarGridSpec(
            num_scalar_prefetch=0,
            grid=(B,),
            in_specs=[
                # per-graph X block: streamed + auto double-buffered
                pl.BlockSpec((None, n_pad, D), lambda b: (b, 0, 0)),
                # adjacency + weights: constant block index -> VMEM-resident
                pl.BlockSpec((n_pad, n_pad), lambda b: (0, 0)),
                pl.BlockSpec((D, H1), lambda b: (0, 0)),
                pl.BlockSpec((H1, H2), lambda b: (0, 0)),
            ],
            out_specs=pl.BlockSpec((None, n_pad, n_pad), lambda b: (b, 0, 0)),
        ),
        compiler_params=pltpu.CompilerParams(
            dimension_semantics=("parallel",),
        ),
    )(Xp, adjp, W_base, W_mean)

    # strip padding (padded rows/cols hold sigmoid(0)=0.5, not part of the graph)
    return out[:, :N, :N]


def gae_forward(X, adj, W_base, W_mean):
    """Single-graph forward, matching the PyTorch module's signature."""
    return gae_forward_batched(X[None], adj, W_base, W_mean)[0]


# ---------------------------- pure-JAX reference -----------------------------
def gae_reference(X, adj, W_base, W_mean):
    h = jnp.maximum(adj @ (X @ W_base), 0.0)
    z = adj @ (h @ W_mean)
    return jax.nn.sigmoid(z @ z.T)


# ------------------------------ parameter init -------------------------------
def glorot_init(key, in_dim, out_dim):
    # matches the PyTorch glorot_init: uniform(-r, r), r = sqrt(6/(in+out))
    r = (6.0 / (in_dim + out_dim)) ** 0.5
    return jax.random.uniform(key, (in_dim, out_dim), jnp.float32, -r, r)


def init_params(key, input_dim, h1, h2):
    k0, k1 = jax.random.split(key, 2)
    return {
        "W_base": glorot_init(k0, input_dim, h1),
        "W_mean": glorot_init(k1, h1, h2),
    }


# --------------------------------- main ---------------------------------------
if __name__ == "__main__":
    B = 4            # batch of feature matrices sharing one adjacency
    N = 8            # number of graph nodes (adj.shape[0])
    input_dim = 16
    hidden1 = 32
    hidden2 = 16

    key = jax.random.PRNGKey(0)
    k_adj, k_x, k_param = jax.random.split(key, 3)

    # symmetric binary adjacency with self-loops
    raw = (jax.random.uniform(k_adj, (N, N)) > 0.6).astype(jnp.float32)
    adj = jnp.clip(raw + raw.T + jnp.eye(N, dtype=jnp.float32), 0.0, 1.0)

    X = jax.random.normal(k_x, (B, N, input_dim), jnp.float32)
    params = init_params(k_param, input_dim, hidden1, hidden2)

    A_pred = gae_forward_batched(X, adj, params["W_base"], params["W_mean"])
    A_pred = jax.block_until_ready(A_pred)

    assert A_pred.shape == (B, N, N)
    assert bool(jnp.all(jnp.isfinite(A_pred)))
    assert bool(jnp.all((A_pred >= 0.0) & (A_pred <= 1.0)))

    # numerical parity with the (pure-JAX) reference of the PyTorch module
    ref = jax.vmap(lambda x: gae_reference(x, adj, params["W_base"], params["W_mean"]))(X)
    assert bool(jnp.allclose(A_pred, ref, atol=1e-5, rtol=1e-5))

    # single-graph path (PyTorch-style signature) also works
    single = gae_forward(X[0], adj, params["W_base"], params["W_mean"])
    single = jax.block_until_ready(single)
    assert bool(jnp.allclose(single, ref[0], atol=1e-5, rtol=1e-5))

    print("KERNEL_OK")
</pallas_src>

<mosaic_0001>
module attributes {stable_mosaic.version = 11 : i64} {
  func.func @gae_kernel(%arg0: i32, %arg1: memref<1x128x16xf32, #tpu.memory_space<vmem>>, %arg2: memref<128x128xf32, #tpu.memory_space<vmem>>, %arg3: memref<16x32xf32, #tpu.memory_space<vmem>>, %arg4: memref<32x16xf32, #tpu.memory_space<vmem>>, %arg5: memref<1x128x128xf32, #tpu.memory_space<vmem>>) attributes {dimension_semantics = [#tpu.dimension_semantics<parallel>], iteration_bounds = array<i64: 4>, scalar_prefetch = 0 : i64, scratch_operands = 0 : i64, tpu.core_type = #tpu.core_type<tc>, window_params = [{transform_indices = @transform_0, window_bounds = array<i64: 1, 128, 16>}, {pipeline_mode = #tpu.pipeline_mode<synchronous>, transform_indices = @transform_1, window_bounds = array<i64: 128, 128>}, {pipeline_mode = #tpu.pipeline_mode<synchronous>, transform_indices = @transform_2, window_bounds = array<i64: 16, 32>}, {pipeline_mode = #tpu.pipeline_mode<synchronous>, transform_indices = @transform_3, window_bounds = array<i64: 32, 16>}, {transform_indices = @transform_4, window_bounds = array<i64: 1, 128, 128>}]} {
    %c0 = arith.constant 0 : index
    %c0_0 = arith.constant 0 : index
    %0 = vector.load %arg2[%c0, %c0_0] : memref<128x128xf32, #tpu.memory_space<vmem>>, vector<128x128xf32>
    %c0_1 = arith.constant 0 : index
    %c0_2 = arith.constant 0 : index
    %c0_3 = arith.constant 0 : index
    %1 = vector.load %arg1[%c0_1, %c0_2, %c0_3] : memref<1x128x16xf32, #tpu.memory_space<vmem>>, vector<1x128x16xf32>
    %2 = vector.shape_cast %1 : vector<1x128x16xf32> to vector<128x16xf32>
    %c0_4 = arith.constant 0 : index
    %c0_5 = arith.constant 0 : index
    %3 = vector.load %arg3[%c0_4, %c0_5] : memref<16x32xf32, #tpu.memory_space<vmem>>, vector<16x32xf32>
    %cst = arith.constant dense<0.000000e+00> : vector<128x32xf32>
    %4 = tpu.matmul %2, %3, %cst {dimension_numbers = #tpu.dot_dimension_numbers<[1], [0], [0], [1], [0, 0, 1, 1], [], []>} : vector<128x16xf32>, vector<16x32xf32>, vector<128x32xf32> -> vector<128x32xf32>
    %cst_6 = arith.constant dense<0.000000e+00> : vector<128x32xf32>
    %5 = tpu.matmul %0, %4, %cst_6 {dimension_numbers = #tpu.dot_dimension_numbers<[1], [0], [0], [1], [0, 0, 1, 1], [], []>} : vector<128x128xf32>, vector<128x32xf32>, vector<128x32xf32> -> vector<128x32xf32>
    %cst_7 = arith.constant 0.000000e+00 : f32
    %6 = vector.broadcast %cst_7 : f32 to vector<128x32xf32>
    %7 = arith.maximumf %5, %6 : vector<128x32xf32>
    %c0_8 = arith.constant 0 : index
    %c0_9 = arith.constant 0 : index
    %8 = vector.load %arg4[%c0_8, %c0_9] : memref<32x16xf32, #tpu.memory_space<vmem>>, vector<32x16xf32>
    %cst_10 = arith.constant dense<0.000000e+00> : vector<128x16xf32>
    %9 = tpu.matmul %7, %8, %cst_10 {dimension_numbers = #tpu.dot_dimension_numbers<[1], [0], [0], [1], [0, 0, 1, 1], [], []>} : vector<128x32xf32>, vector<32x16xf32>, vector<128x16xf32> -> vector<128x16xf32>
    %cst_11 = arith.constant dense<0.000000e+00> : vector<128x16xf32>
    %10 = tpu.matmul %0, %9, %cst_11 {dimension_numbers = #tpu.dot_dimension_numbers<[1], [0], [0], [1], [0, 0, 1, 1], [], []>} : vector<128x128xf32>, vector<128x16xf32>, vector<128x16xf32> -> vector<128x16xf32>
    %cst_12 = arith.constant dense<0.000000e+00> : vector<128x128xf32>
    %11 = tpu.matmul %10, %10, %cst_12 {dimension_numbers = #tpu.dot_dimension_numbers<[1], [1], [0], [0], [0, 0, 1, 0], [], []>} : vector<128x16xf32>, vector<128x16xf32>, vector<128x128xf32> -> vector<128x128xf32>
    %cst_13 = arith.constant 0.000000e+00 : f32
    %12 = vector.broadcast %cst_13 : f32 to vector<128x128xf32>
    %13 = arith.subf %12, %11 : vector<128x128xf32>
    %14 = math.exp %13 : vector<128x128xf32>
    %cst_14 = arith.constant 1.000000e+00 : f32
    %15 = vector.broadcast %cst_14 : f32 to vector<128x128xf32>
    %16 = arith.addf %15, %14 : vector<128x128xf32>
    %17 = tpu.reciprocal %16 : vector<128x128xf32> -> vector<128x128xf32>
    %c0_15 = arith.constant 0 : index
    %c0_16 = arith.constant 0 : index
    %c0_17 = arith.constant 0 : index
    %18 = vector.load %arg5[%c0_15, %c0_16, %c0_17] : memref<1x128x128xf32, #tpu.memory_space<vmem>>, vector<1x128x128xf32>
    %19 = vector.shape_cast %18 : vector<1x128x128xf32> to vector<128x128xf32>
    %20 = vector.shape_cast %17 : vector<128x128xf32> to vector<1x128x128xf32>
    tpu.vector_store %arg5[%c0_15, %c0_16, %c0_17], %20 {strides = array<i32>} : memref<1x128x128xf32, #tpu.memory_space<vmem>>, vector<1x128x128xf32>,
    return
  }
  func.func @transform_0(%arg0: i32) -> (i32, i32, i32) {
    %c0_i32 = arith.constant 0 : i32
    %c0_i32_0 = arith.constant 0 : i32
    %c0_i32_1 = arith.constant 0 : i32
    return %arg0, %c0_i32, %c0_i32_0 : i32, i32, i32
  }
  func.func @transform_1(%arg0: i32) -> (i32, i32) {
    %c0_i32 = arith.constant 0 : i32
    %c0_i32_0 = arith.constant 0 : i32
    %c0_i32_1 = arith.constant 0 : i32
    return %c0_i32, %c0_i32_0 : i32, i32
  }
  func.func @transform_2(%arg0: i32) -> (i32, i32) {
    %c0_i32 = arith.constant 0 : i32
    %c0_i32_0 = arith.constant 0 : i32
    %c0_i32_1 = arith.constant 0 : i32
    return %c0_i32, %c0_i32_0 : i32, i32
  }
  func.func @transform_3(%arg0: i32) -> (i32, i32) {
    %c0_i32 = arith.constant 0 : i32
    %c0_i32_0 = arith.constant 0 : i32
    %c0_i32_1 = arith.constant 0 : i32
    return %c0_i32, %c0_i32_0 : i32, i32
  }
  func.func @transform_4(%arg0: i32) -> (i32, i32, i32) {
    %c0_i32 = arith.constant 0 : i32
    %c0_i32_0 = arith.constant 0 : i32
    %c0_i32_1 = arith.constant 0 : i32
    return %arg0, %c0_i32, %c0_i32_0 : i32, i32, i32
  }
}

</mosaic_0001>

<bundles_post_ra>
// kernel: tpu_custom_call.1
= control target key start
LH: loop header
LB: loop body
LE: loop exit
PB: predicated region body
PF: predicated region fallthrough
CT: control target
= control target key end

     0   :  { %9 = vsyncpa [#allocation3], 0  ;;  %s1960_s0 = inlined_call_operand.vmem [shape: f32[4,128,16], index: 0, kind: input, shape index: {}]   ;;  %s1961_s1 = inlined_call_operand.vmem [shape: f32[128,128], index: 1, kind: input, shape index: {}]   ;;  %s1962_s2 = inlined_call_operand.vmem [shape: f32[16,32], index: 2, kind: input, shape index: {}]   ;;  %s1963_s3 = inlined_call_operand.vmem [shape: f32[32,16], index: 3, kind: input, shape index: {}]   ;;  %s1964_s4 = inlined_call_operand.hbm [shape: f32[4,128,128], index: 4, kind: output, shape index: {}]  }
   0x1   :  { %11 = vsyncpa [#allocation3 + $0x1], 0  ;;  %s1429_s15 = smov 0   ;;  %s1431_s16 = smov 0  }
   0x2   :  { %s1433_s17 = smov 0   ;;  %s1435_s18 = smov 0  }
   0x3 LB: > { %s1450_s19 = sadd.s32 4294967295, %s1400_s18   ;;  %s1103_s20 = sadd.s32 4294967294, %s1400_s18   ;;  %s1400_s18 = sphi %s1435_s18, %s1976_s18   ;;  %s1396_s17 = sphi %s1433_s17, %s1975_s17   ;;  %s1392_s16 = sphi %s1431_s16, %s1974_s16   ;;  %s1388_s15 = sphi %s1429_s15, %s1973_s15  }
   0x4   : > { %s1454_s21 = sadd.s32 1, %s1400_s18   ;;  %s113_s22 = sadd.s32 1, %s1396_s17 }
   0x5   : > { %s110_s23 = ssub.s32 %s1400_s18, %s1454_s21  ;;  %p123_p0 = scmp.ne.s32.totalorder %s1396_s17, %s1392_s16 }
   0x6   : > { %p111_p1 = scmp.eq.s32.totalorder %s110_s23, 0  ;;  %p124_p2 = scmp.eq.s32.totalorder %s1450_s19, 3 }
   0x7   : > { %p129_p3 = scmp.ne.s32.totalorder %s1392_s16, %s1388_s15  ;;  %p130_p4 = scmp.eq.s32.totalorder %s1103_s20, 3 }
   0x8   : > { %s1465_s24 = scalar_select %p111_p1, %s1396_s17, %s113_s22  }
   0x9   : > { %p1467_p5 = por %p124_p2, %p123_p0  ;;  %p1471_p6 = por %p130_p4, %p129_p3 }
   0xa   : > { %p1106_p7 = scmp.ge.s32.totalorder %s1400_s18, 1  ;;  %p165_p8 = scmp.lt.s32.totalorder %s1400_s18, 5 }
   0xc   : > { %p166_p9 = pnand %p1106_p7, %p165_p8 }
   0xd   : > { %p191_p10 = scmp.lt.s32.totalorder (!%p166_p9), %s1450_s19, 3  ;;  %s188_s22 = sand.u32 (!%p166_p9), 1, %s1392_s16  }
   0xe   : > { %169 = sbr.rel (%p166_p9) target bundleno = 1203 (0x4b3), region = 36  ;;  %s1107_s23 = sshll.u32 (!%p166_p9), %s188_s22, 7 }
   0xf   : > { %s1876_s27 = scalar_lea.vmem (!%p166_p9), [#allocation2], %s1107_s23  ;;  %s1180_s28 = sshll.u32 (!%p166_p9), %s1450_s19, 7 }
  0x10   : > { %s1358_s12 = scalar_lea.hbm (!%p166_p9), %s1964_s4, 512 }
  0x13   : > { %v229_v0 = vld [vmem:[%s1962_s2 + $0x8] sm:$0xff]  ;;  %v228_v1 = vld [vmem:[%s1962_s2] sm:$0xff]  ;;  %s192_s5 = scalar_select %p191_p10, %s1450_s19, 3  ;;  %vm230_vm0 = vcmask 130048   ;;  %v1537_v36 = vld [vmem:[%s1961_s1 + $0x10] sm:$0xff]  ;;  %vm429_vm1 = vcmask 261120  }
  0x14   : > { %293 = vmatpush.msra.mxu0 %v229_v0  ;;  %1182 = vmatpush.msra.mxu3 %v229_v0  ;;  %v1525_v34 = vld [vmem:[%s1961_s1] sm:$0xff]  ;;  %v1531_v35 = vld [vmem:[%s1961_s1 + $0x8] sm:$0xff]  ;;  %v1543_v37 = vld [vmem:[%s1961_s1 + $0x18] sm:$0xff]  ;;  %s1026_s19 = scalar_lea.sflag [#allocation3], %s188_s22 }
  0x15   : > { %1181 = vmatpush.msra.mxu2 %v229_v0  ;;  %s1179_s6 = sshll.u32 %s192_s5, 7  ;;  %v1549_v38 = vld [vmem:[%s1961_s1 + $0x20] sm:$0xff]  ;;  %v1555_v39 = vld [vmem:[%s1961_s1 + $0x28] sm:$0xff]  ;;  %v1561_v40 = vld [vmem:[%s1961_s1 + $0x30] sm:$0xff]  ;;  %s1037_s5 = scalar_lea.hbm %s1964_s4, %s1180_s28 }
  0x16   : > { %294 = vmatpush.msra.mxu0 %v228_v1  ;;  %1184 = vmatpush.msra.mxu3 %v228_v1  ;;  %s1488_s9 = scalar_lea.vmem %s1960_s0, %s1179_s6  ;;  %v1567_v41 = vld [vmem:[%s1961_s1 + $0x38] sm:$0xff]  ;;  %v1573_v42 = vld [vmem:[%s1961_s1 + $0x40] sm:$0xff]  ;;  %v1582_v44 = vld [vmem:[%s1961_s1 + $0x48] sm:$0xff]  ;;  %s1038_s6 = sshll.u32 %s1876_s27, 4  ;;  %s1039_s6 = int_to_ptr.vmem [resolvable:$true] %s1038_s6 }
  0x17   : > { %1183 = vmatpush.msra.mxu2 %v228_v1  ;;  %v212_v2 = vld [vmem:[%s1488_s9] sm:$0xff]  ;;  %v213_v5 = vld [vmem:[%s1488_s9 + $0x8] sm:$0xff]  ;;  %v214_v8 = vld [vmem:[%s1488_s9 + $0x10] sm:$0xff]  ;;  %s1040_s7 = sshll.u32 %s1037_s5, 4  ;;  %s1041_s7 = int_to_ptr.hbm [resolvable:$true] %s1040_s7 }
  0x18   : > { %v224_v3 = vld [vmem:[%s1488_s9 + $0x60] sm:$0xff]  ;;  %1110 = vmatmul.msk.f32.vlgmr.msra.gmra.mxu0 %vm230_vm0, %v212_v2  ;;  %v225_v6 = vld [vmem:[%s1488_s9 + $0x68] sm:$0xff]  ;;  %v226_v9 = vld [vmem:[%s1488_s9 + $0x70] sm:$0xff]  ;;  %s1352_s8 = sshra.s32 %s1041_s7, 4  ;;  %s1353_s8 = int_to_ptr.hbm [resolvable:$true] %s1352_s8 }
  0x19   : > { %1122 = vmatmul.msk.f32.vlgmr.msra.gmra.mxu3 %vm230_vm0, %v224_v3  ;;  %v220_v4 = vld [vmem:[%s1488_s9 + $0x40] sm:$0xff]  ;;  %v221_v7 = vld [vmem:[%s1488_s9 + $0x48] sm:$0xff]  ;;  %v222_v10 = vld [vmem:[%s1488_s9 + $0x50] sm:$0xff]  ;;  %p1359_p0 = scmp.lt.s32.totalorder %s1353_s8, %s1964_s4 }
  0x1a   : > { %1118 = vmatmul.msk.f32.vlgmr.msra.gmra.mxu2 %vm230_vm0, %v220_v4  ;;  %v215_v11 = vld [vmem:[%s1488_s9 + $0x18] sm:$0xff]  ;;  %v216_v14 = vld [vmem:[%s1488_s9 + $0x20] sm:$0xff]  ;;  %v217_v15 = vld [vmem:[%s1488_s9 + $0x28] sm:$0xff] }
  0x1b   : > { %v227_v12 = vld [vmem:[%s1488_s9 + $0x78] sm:$0xff]  ;;  %v218_v16 = vld [vmem:[%s1488_s9 + $0x30] sm:$0xff]  ;;  %v426_v47 = vld [vmem:[%s1963_s3 + $0x8] sm:$0xff] }
  0x1c   : > { %v223_v13 = vld [vmem:[%s1488_s9 + $0x58] sm:$0xff]  ;;  %v427_v45 = vld [vmem:[%s1963_s3 + $0x10] sm:$0xff]  ;;  %v425_v49 = vld [vmem:[%s1963_s3] sm:$0xff] }
  0x1d   : > { %v219_v17 = vld [vmem:[%s1488_s9 + $0x38] sm:$0xff]  ;;  %v1591_v46 = vld [vmem:[%s1961_s1 + $0x50] sm:$0xff]  ;;  %v1609_v50 = vld [vmem:[%s1961_s1 + $0x60] sm:$0xff]  ;;  %s1354_s9 = scalar_lea.hbm %s1353_s8, 128 }
  0x1e   : > { %v428_v43 = vld [vmem:[%s1963_s3 + $0x18] sm:$0xff]  ;;  %v1615_v51 = vld [vmem:[%s1961_s1 + $0x68] sm:$0xff]  ;;  %v1621_v52 = vld [vmem:[%s1961_s1 + $0x70] sm:$0xff]  ;;  %p1355_p11 = scmp.ne.s32.totalorder %s1353_s8, %s1354_s9  ;;  %p1360_p1 = scmp.lt.s32.totalorder %s1358_s12, %s1354_s9 }
  0x1f   : > { %490 = vmatpush.msrb.mxu2 %v428_v43  ;;  %v1600_v48 = vld [vmem:[%s1961_s1 + $0x58] sm:$0xff] }
  0x20   : > { %1111 = vmatmul.msk.f32.gmra.mxu0 %vm230_vm0, %v213_v5  ;;  %v1627_v53 = vld [vmem:[%s1961_s1 + $0x78] sm:$0xff]  ;;  %p1356_p12 = pnand %p1355_p11, %p1467_p5  ;;  %p1361_p2 = por %p1360_p1, %p1359_p0 }
  0x21   : > { %1123 = vmatmul.msk.f32.gmra.mxu3 %vm230_vm0, %v225_v6  ;;  %491 = vmatpush.msrb.mxu2 %v427_v45 }
  0x22   : > { %1119 = vmatmul.msk.f32.gmra.mxu2 %vm230_vm0, %v221_v7  ;;  %p1357_p13 = pneg %p1356_p12 }
  0x23   : > { %492 = vmatpush.msrb.mxu2 %v426_v47 }
  0x24   : > { %p1362_p3 = pnand %p1361_p2, %p1357_p13 }
  0x25   : > { %493 = vmatpush.msrb.mxu2 %v425_v49 }
  0x28   : > { %1112 = vmatmul.msk.f32.gmra.mxu0 %vm230_vm0, %v214_v8 }
  0x29   : > { %1124 = vmatmul.msk.f32.gmra.mxu3 %vm230_vm0, %v226_v9 }
  0x2a   : > { %1120 = vmatmul.msk.f32.gmra.mxu2 %vm230_vm0, %v222_v10 }
  0x30   : > { %1113 = vmatmul.msk.f32.gmra.mxu0 %vm230_vm0, %v215_v11 }
  0x31   : > { %1125 = vmatmul.msk.f32.gmra.mxu3 %vm230_vm0, %v227_v12 }
  0x32   : > { %1121 = vmatmul.msk.f32.gmra.mxu2 %vm230_vm0, %v223_v13 }
  0x38   : > { %1114 = vmatmul.msk.f32.gmra.mxu0 %vm230_vm0, %v216_v14 }
  0x40   : > { %1115 = vmatmul.msk.f32.gmra.mxu0 %vm230_vm0, %v217_v15 }
  0x48   : > { %1116 = vmatmul.msk.f32.gmra.mxu0 %vm230_vm0, %v218_v16 }
  0x50   : > { %1117 = vmatmul.msk.f32.gmra.mxu0 %vm230_vm0, %v219_v17 }
  0x95   : > { %v296_v18 = vpop.f32.mrf.mxu0 }
  0x9c   : > { %v332_v19 = vpop.f32.mrf.mxu3 }
  0x9d   : > { %v320_v20 = vpop.f32.mrf.mxu2  ;;  %v299_v21 = vpop.f32.mrf.mxu0 }
  0xa4   : > { %v335_v22 = vpop.f32.mrf.mxu3 }
  0xa5   : > { %v302_v23 = vpop.f32.mrf.mxu0  ;;  %v323_v24 = vpop.f32.mrf.mxu2 }
  0xac   : > { %v338_v25 = vpop.f32.mrf.mxu3 }
  0xad   : > { %v305_v26 = vpop.f32.mrf.mxu0  ;;  %v326_v27 = vpop.f32.mrf.mxu2 }
  0xb4   : > { %v341_v28 = vpop.f32.mrf.mxu3 }
  0xb5   : > { %344 = vmatpush.msra.mxu1 %v341_v28  ;;  %v308_v29 = vpop.f32.mrf.mxu0  ;;  %v329_v30 = vpop.f32.mrf.mxu2 }
  0xb7   : > { %345 = vmatpush.msra.mxu1 %v338_v25 }
  0xb9   : > { %346 = vmatpush.msra.mxu1 %v335_v22 }
  0xbb   : > { %347 = vmatpush.msra.mxu1 %v332_v19 }
  0xbd   : > { %348 = vmatpush.msra.mxu1 %v329_v30  ;;  %v311_v31 = vpop.f32.mrf.mxu0 }
  0xbf   : > { %349 = vmatpush.msra.mxu1 %v326_v27 }
  0xc1   : > { %350 = vmatpush.msra.mxu1 %v323_v24 }
  0xc3   : > { %351 = vmatpush.msra.mxu1 %v320_v20 }
  0xc5   : > { %v314_v32 = vpop.f32.mrf.mxu0 }
  0xcd   : > { %v317_v33 = vpop.f32.mrf.mxu0 }
  0xce   : > { %352 = vmatpush.msra.mxu1 %v317_v33 }
  0xd0   : > { %353 = vmatpush.msra.mxu1 %v314_v32 }
  0xd2   : > { %354 = vmatpush.msra.mxu1 %v311_v31 }
  0xd4   : > { %355 = vmatpush.msra.mxu1 %v308_v29 }
  0xd6   : > { %356 = vmatpush.msra.mxu1 %v305_v26 }
  0xd8   : > { %357 = vmatpush.msra.mxu1 %v302_v23 }
  0xda   : > { %358 = vmatpush.msra.mxu1 %v299_v21 }
  0xdc   : > { %359 = vmatpush.msra.mxu1 %v296_v18 }
  0xdd   : > { %360 = vmatmul.f32.vlgmr.msra.gmra.mxu1 %v1525_v34 }
  0xe5   : > { %363 = vmatmul.f32.gmra.mxu1 %v1531_v35 }
  0xed   : > { %366 = vmatmul.f32.gmra.mxu1 %v1537_v36 }
  0xf5   : > { %369 = vmatmul.f32.gmra.mxu1 %v1543_v37 }
  0xfd   : > { %372 = vmatmul.f32.gmra.mxu1 %v1549_v38 }
 0x105   : > { %375 = vmatmul.f32.gmra.mxu1 %v1555_v39 }
 0x10d   : > { %378 = vmatmul.f32.gmra.mxu1 %v1561_v40 }
 0x115   : > { %381 = vmatmul.f32.gmra.mxu1 %v1567_v41 }
 0x11d   : > { %384 = vmatmul.f32.gmra.mxu1 %v1573_v42 }
 0x125   : > { %387 = vmatmul.f32.gmra.mxu1 %v1582_v44 }
 0x12d   : > { %390 = vmatmul.f32.gmra.mxu1 %v1591_v46 }
 0x135   : > { %393 = vmatmul.f32.gmra.mxu1 %v1600_v48 }
 0x13d   : > { %396 = vmatmul.f32.gmra.mxu1 %v1609_v50 }
 0x145   : > { %399 = vmatmul.f32.gmra.mxu1 %v1615_v51 }
 0x14d   : > { %402 = vmatmul.f32.gmra.mxu1 %v1621_v52 }
 0x155   : > { %405 = vmatmul.f32.gmra.mxu1 %v1627_v53 }
 0x15a   : > { %v361_v54 = vpop.f32.mrf.mxu1 }
 0x15b   : > { %v409_v55 = vmax.f32 %v361_v54, 0.0 }
 0x15d   : > { %1126 = vmatmul.msk.f32.vlgmr.msrb.gmra.mxu2 %vm429_vm1, %v409_v55 }
 0x162   : > { %v364_v56 = vpop.f32.mrf.mxu1 }
 0x163   : > { %v410_v57 = vmax.f32 %v364_v56, 0.0 }
 0x165   : > { %1127 = vmatmul.msk.f32.gmra.mxu2 %vm429_vm1, %v410_v57 }
 0x16a   : > { %v367_v58 = vpop.f32.mrf.mxu1 }
 0x16b   : > { %v411_v59 = vmax.f32 %v367_v58, 0.0 }
 0x16d   : > { %1128 = vmatmul.msk.f32.gmra.mxu2 %vm429_vm1, %v411_v59 }
 0x172   : > { %v370_v60 = vpop.f32.mrf.mxu1 }
 0x173   : > { %v412_v61 = vmax.f32 %v370_v60, 0.0 }
 0x175   : > { %1129 = vmatmul.msk.f32.gmra.mxu2 %vm429_vm1, %v412_v61 }
 0x17a   : > { %v373_v62 = vpop.f32.mrf.mxu1 }
 0x17b   : > { %v413_v63 = vmax.f32 %v373_v62, 0.0 }
 0x17d   : > { %1130 = vmatmul.msk.f32.gmra.mxu2 %vm429_vm1, %v413_v63 }
 0x182   : > { %v376_v0 = vpop.f32.mrf.mxu1 }
 0x183   : > { %v414_v1 = vmax.f32 %v376_v0, 0.0 }
 0x185   : > { %1131 = vmatmul.msk.f32.gmra.mxu2 %vm429_vm1, %v414_v1 }
 0x18a   : > { %v379_v2 = vpop.f32.mrf.mxu1 }
 0x18b   : > { %v415_v3 = vmax.f32 %v379_v2, 0.0 }
 0x18d   : > { %1132 = vmatmul.msk.f32.gmra.mxu2 %vm429_vm1, %v415_v3 }
 0x192   : > { %v382_v4 = vpop.f32.mrf.mxu1 }
 0x193   : > { %v416_v5 = vmax.f32 %v382_v4, 0.0 }
 0x195   : > { %1133 = vmatmul.msk.f32.gmra.mxu2 %vm429_vm1, %v416_v5 }
 0x19a   : > { %v385_v6 = vpop.f32.mrf.mxu1 }
 0x19b   : > { %v417_v7 = vmax.f32 %v385_v6, 0.0 }
 0x19d   : > { %1134 = vmatmul.msk.f32.gmra.mxu2 %vm429_vm1, %v417_v7 }
 0x1a2   : > { %v388_v8 = vpop.f32.mrf.mxu1 }
 0x1a3   : > { %v418_v9 = vmax.f32 %v388_v8, 0.0 }
 0x1a5   : > { %1135 = vmatmul.msk.f32.gmra.mxu2 %vm429_vm1, %v418_v9 }
 0x1aa   : > { %v391_v10 = vpop.f32.mrf.mxu1 }
 0x1ab   : > { %v419_v11 = vmax.f32 %v391_v10, 0.0 }
 0x1ad   : > { %1136 = vmatmul.msk.f32.gmra.mxu2 %vm429_vm1, %v419_v11 }
 0x1b2   : > { %v394_v12 = vpop.f32.mrf.mxu1 }
 0x1b3   : > { %v420_v13 = vmax.f32 %v394_v12, 0.0 }
 0x1b5   : > { %1137 = vmatmul.msk.f32.gmra.mxu2 %vm429_vm1, %v420_v13 }
 0x1ba   : > { %v397_v14 = vpop.f32.mrf.mxu1 }
 0x1bb   : > { %v421_v15 = vmax.f32 %v397_v14, 0.0 }
 0x1bd   : > { %1138 = vmatmul.msk.f32.gmra.mxu2 %vm429_vm1, %v421_v15 }
 0x1c2   : > { %v400_v16 = vpop.f32.mrf.mxu1 }
 0x1c3   : > { %v422_v17 = vmax.f32 %v400_v16, 0.0 }
 0x1c5   : > { %1139 = vmatmul.msk.f32.gmra.mxu2 %vm429_vm1, %v422_v17 }
 0x1ca   : > { %v403_v18 = vpop.f32.mrf.mxu1 }
 0x1cb   : > { %v423_v19 = vmax.f32 %v403_v18, 0.0 }
 0x1cd   : > { %1140 = vmatmul.msk.f32.gmra.mxu2 %vm429_vm1, %v423_v19 }
 0x1d2   : > { %v406_v20 = vpop.f32.mrf.mxu1 }
 0x1d3   : > { %v424_v21 = vmax.f32 %v406_v20, 0.0 }
 0x1d5   : > { %1141 = vmatmul.msk.f32.gmra.mxu2 %vm429_vm1, %v424_v21 }
 0x1e0   : > { %v495_v22 = vpop.f32.mrf.mxu2 }
 0x1e8   : > { %v498_v23 = vpop.f32.mrf.mxu2 }
 0x1f0   : > { %v501_v24 = vpop.f32.mrf.mxu2 }
 0x1f8   : > { %v504_v25 = vpop.f32.mrf.mxu2 }
 0x200   : > { %v507_v26 = vpop.f32.mrf.mxu2 }
 0x208   : > { %v510_v27 = vpop.f32.mrf.mxu2 }
 0x210   : > { %v513_v28 = vpop.f32.mrf.mxu2 }
 0x218   : > { %v516_v29 = vpop.f32.mrf.mxu2 }
 0x220   : > { %v519_v30 = vpop.f32.mrf.mxu2 }
 0x228   : > { %v522_v31 = vpop.f32.mrf.mxu2 }
 0x230   : > { %v525_v32 = vpop.f32.mrf.mxu2 }
 0x238   : > { %v528_v33 = vpop.f32.mrf.mxu2 }
 0x240   : > { %v531_v43 = vpop.f32.mrf.mxu2 }
 0x248   : > { %v534_v45 = vpop.f32.mrf.mxu2 }
 0x250   : > { %v537_v47 = vpop.f32.mrf.mxu2 }
 0x258   : > { %v540_v49 = vpop.f32.mrf.mxu2 }
 0x259   : > { %543 = vmatpush.msrb.mxu3 %v540_v49 }
 0x25b   : > { %544 = vmatpush.msrb.mxu3 %v537_v47 }
 0x25d   : > { %545 = vmatpush.msrb.mxu3 %v534_v45 }
 0x25f   : > { %546 = vmatpush.msrb.mxu3 %v531_v43 }
 0x261   : > { %547 = vmatpush.msrb.mxu3 %v528_v33 }
 0x263   : > { %548 = vmatpush.msrb.mxu3 %v525_v32 }
 0x265   : > { %549 = vmatpush.msrb.mxu3 %v522_v31 }
 0x267   : > { %550 = vmatpush.msrb.mxu3 %v519_v30 }
 0x269   : > { %551 = vmatpush.msrb.mxu3 %v516_v29 }
 0x26b   : > { %552 = vmatpush.msrb.mxu3 %v513_v28 }
 0x26d   : > { %553 = vmatpush.msrb.mxu3 %v510_v27 }
 0x26f   : > { %554 = vmatpush.msrb.mxu3 %v507_v26 }
 0x271   : > { %555 = vmatpush.msrb.mxu3 %v504_v25 }
 0x273   : > { %556 = vmatpush.msrb.mxu3 %v501_v24 }
 0x275   : > { %557 = vmatpush.msrb.mxu3 %v498_v23 }
 0x277   : > { %558 = vmatpush.msrb.mxu3 %v495_v22 }
 0x278   : > { %559 = vmatmul.f32.vlgmr.msrb.gmra.mxu3 %v1525_v34 }
 0x280   : > { %562 = vmatmul.f32.gmra.mxu3 %v1531_v35 }
 0x288   : > { %565 = vmatmul.f32.gmra.mxu3 %v1537_v36 }
 0x290   : > { %568 = vmatmul.f32.gmra.mxu3 %v1543_v37 }
 0x298   : > { %571 = vmatmul.f32.gmra.mxu3 %v1549_v38 }
 0x2a0   : > { %574 = vmatmul.f32.gmra.mxu3 %v1555_v39 }
 0x2a8   : > { %577 = vmatmul.f32.gmra.mxu3 %v1561_v40 }
 0x2b0   : > { %580 = vmatmul.f32.gmra.mxu3 %v1567_v41 }
 0x2b8   : > { %583 = vmatmul.f32.gmra.mxu3 %v1573_v42 }
 0x2c0   : > { %586 = vmatmul.f32.gmra.mxu3 %v1582_v44 }
 0x2c8   : > { %589 = vmatmul.f32.gmra.mxu3 %v1591_v46 }
 0x2d0   : > { %592 = vmatmul.f32.gmra.mxu3 %v1600_v48 }
 0x2d8   : > { %595 = vmatmul.f32.gmra.mxu3 %v1609_v50 }
 0x2e0   : > { %598 = vmatmul.f32.gmra.mxu3 %v1615_v51 }
 0x2e8   : > { %601 = vmatmul.f32.gmra.mxu3 %v1621_v52 }
 0x2f0   : > { %604 = vmatmul.f32.gmra.mxu3 %v1627_v53 }
 0x2fb   : > { %v1662_v34 = vpop.f32.mrf.mxu3 }
 0x303   : > { %v1664_v35 = vpop.f32.mrf.mxu3 }
 0x30b   : > { %v1666_v36 = vpop.f32.mrf.mxu3 }
 0x313   : > { %v1668_v37 = vpop.f32.mrf.mxu3 }
 0x31b   : > { %v1670_v38 = vpop.f32.mrf.mxu3 }
 0x323   : > { %v1672_v39 = vpop.f32.mrf.mxu3 }
 0x32b   : > { %v1674_v40 = vpop.f32.mrf.mxu3 }
 0x333   : > { %v1676_v41 = vpop.f32.mrf.mxu3 }
 0x33b   : > { %v1678_v42 = vpop.f32.mrf.mxu3 }
 0x343   : > { %v1680_v44 = vpop.f32.mrf.mxu3 }
 0x34b   : > { %v1682_v46 = vpop.f32.mrf.mxu3 }
 0x353   : > { %v1684_v48 = vpop.f32.mrf.mxu3 }
 0x35b   : > { %v1686_v50 = vpop.f32.mrf.mxu3 }
 0x363   : > { %v1688_v51 = vpop.f32.mrf.mxu3 }
 0x36b   : > { %v1690_v52 = vpop.f32.mrf.mxu3 }
 0x373   : > { %v1692_v53 = vpop.f32.mrf.mxu3 }
 0x374   : > { %1142 = vmatpush.xpose.msk.msrb.mxu0 %vm230_vm0, %v1692_v53  ;;  %1185 = vmatpush.xpose.msk.msrb.mxu1 %vm230_vm0, %v1692_v53 }
 0x375   : > { %1186 = vmatpush.xpose.msk.msra.mxu2 %vm230_vm0, %v1692_v53  ;;  %1187 = vmatpush.xpose.msk.msra.mxu3 %vm230_vm0, %v1692_v53 }
 0x378   : > { %1143 = vmatpush.xpose.msk.msrb.mxu0 %vm230_vm0, %v1690_v52  ;;  %1188 = vmatpush.xpose.msk.msrb.mxu1 %vm230_vm0, %v1690_v52 }
 0x379   : > { %1189 = vmatpush.xpose.msk.msra.mxu2 %vm230_vm0, %v1690_v52  ;;  %1190 = vmatpush.xpose.msk.msra.mxu3 %vm230_vm0, %v1690_v52 }
 0x37c   : > { %1144 = vmatpush.xpose.msk.msrb.mxu0 %vm230_vm0, %v1688_v51  ;;  %1191 = vmatpush.xpose.msk.msrb.mxu1 %vm230_vm0, %v1688_v51 }
 0x37d   : > { %1192 = vmatpush.xpose.msk.msra.mxu2 %vm230_vm0, %v1688_v51  ;;  %1193 = vmatpush.xpose.msk.msra.mxu3 %vm230_vm0, %v1688_v51 }
 0x380   : > { %1145 = vmatpush.xpose.msk.msrb.mxu0 %vm230_vm0, %v1686_v50  ;;  %1194 = vmatpush.xpose.msk.msrb.mxu1 %vm230_vm0, %v1686_v50 }
 0x381   : > { %1195 = vmatpush.xpose.msk.msra.mxu2 %vm230_vm0, %v1686_v50  ;;  %1196 = vmatpush.xpose.msk.msra.mxu3 %vm230_vm0, %v1686_v50 }
 0x384   : > { %1146 = vmatpush.xpose.msk.msrb.mxu0 %vm230_vm0, %v1684_v48  ;;  %1197 = vmatpush.xpose.msk.msrb.mxu1 %vm230_vm0, %v1684_v48 }
 0x385   : > { %1198 = vmatpush.xpose.msk.msra.mxu2 %vm230_vm0, %v1684_v48  ;;  %1199 = vmatpush.xpose.msk.msra.mxu3 %vm230_vm0, %v1684_v48 }
 0x388   : > { %1147 = vmatpush.xpose.msk.msrb.mxu0 %vm230_vm0, %v1682_v46  ;;  %1200 = vmatpush.xpose.msk.msrb.mxu1 %vm230_vm0, %v1682_v46 }
 0x389   : > { %1201 = vmatpush.xpose.msk.msra.mxu2 %vm230_vm0, %v1682_v46  ;;  %1202 = vmatpush.xpose.msk.msra.mxu3 %vm230_vm0, %v1682_v46 }
 0x38c   : > { %1148 = vmatpush.xpose.msk.msrb.mxu0 %vm230_vm0, %v1680_v44  ;;  %1203 = vmatpush.xpose.msk.msrb.mxu1 %vm230_vm0, %v1680_v44 }
 0x38d   : > { %1204 = vmatpush.xpose.msk.msra.mxu2 %vm230_vm0, %v1680_v44  ;;  %1205 = vmatpush.xpose.msk.msra.mxu3 %vm230_vm0, %v1680_v44 }
 0x390   : > { %1149 = vmatpush.xpose.msk.msrb.mxu0 %vm230_vm0, %v1678_v42  ;;  %1206 = vmatpush.xpose.msk.msrb.mxu1 %vm230_vm0, %v1678_v42 }
 0x391   : > { %1207 = vmatpush.xpose.msk.msra.mxu2 %vm230_vm0, %v1678_v42  ;;  %1208 = vmatpush.xpose.msk.msra.mxu3 %vm230_vm0, %v1678_v42 }
 0x394   : > { %1150 = vmatpush.xpose.msk.msrb.mxu0 %vm230_vm0, %v1676_v41  ;;  %1209 = vmatpush.xpose.msk.msrb.mxu1 %vm230_vm0, %v1676_v41 }
 0x395   : > { %1210 = vmatpush.xpose.msk.msra.mxu2 %vm230_vm0, %v1676_v41  ;;  %1211 = vmatpush.xpose.msk.msra.mxu3 %vm230_vm0, %v1676_v41 }
 0x398   : > { %1151 = vmatpush.xpose.msk.msrb.mxu0 %vm230_vm0, %v1674_v40  ;;  %1212 = vmatpush.xpose.msk.msrb.mxu1 %vm230_vm0, %v1674_v40 }
 0x399   : > { %1213 = vmatpush.xpose.msk.msra.mxu2 %vm230_vm0, %v1674_v40  ;;  %1214 = vmatpush.xpose.msk.msra.mxu3 %vm230_vm0, %v1674_v40 }
 0x39c   : > { %1152 = vmatpush.xpose.msk.msrb.mxu0 %vm230_vm0, %v1672_v39  ;;  %1215 = vmatpush.xpose.msk.msrb.mxu1 %vm230_vm0, %v1672_v39 }
 0x39d   : > { %1216 = vmatpush.xpose.msk.msra.mxu2 %vm230_vm0, %v1672_v39  ;;  %1217 = vmatpush.xpose.msk.msra.mxu3 %vm230_vm0, %v1672_v39 }
 0x3a0   : > { %1153 = vmatpush.xpose.msk.msrb.mxu0 %vm230_vm0, %v1670_v38  ;;  %1218 = vmatpush.xpose.msk.msrb.mxu1 %vm230_vm0, %v1670_v38 }
 0x3a1   : > { %1219 = vmatpush.xpose.msk.msra.mxu2 %vm230_vm0, %v1670_v38  ;;  %1220 = vmatpush.xpose.msk.msra.mxu3 %vm230_vm0, %v1670_v38 }
 0x3a4   : > { %1154 = vmatpush.xpose.msk.msrb.mxu0 %vm230_vm0, %v1668_v37  ;;  %1221 = vmatpush.xpose.msk.msrb.mxu1 %vm230_vm0, %v1668_v37 }
 0x3a5   : > { %1222 = vmatpush.xpose.msk.msra.mxu2 %vm230_vm0, %v1668_v37  ;;  %1223 = vmatpush.xpose.msk.msra.mxu3 %vm230_vm0, %v1668_v37 }
 0x3a8   : > { %1155 = vmatpush.xpose.msk.msrb.mxu0 %vm230_vm0, %v1666_v36  ;;  %1224 = vmatpush.xpose.msk.msrb.mxu1 %vm230_vm0, %v1666_v36 }
 0x3a9   : > { %1225 = vmatpush.xpose.msk.msra.mxu2 %vm230_vm0, %v1666_v36  ;;  %1226 = vmatpush.xpose.msk.msra.mxu3 %vm230_vm0, %v1666_v36 }
 0x3ac   : > { %1156 = vmatpush.xpose.msk.msrb.mxu0 %vm230_vm0, %v1664_v35  ;;  %1227 = vmatpush.xpose.msk.msrb.mxu1 %vm230_vm0, %v1664_v35 }
 0x3ad   : > { %1228 = vmatpush.xpose.msk.msra.mxu2 %vm230_vm0, %v1664_v35  ;;  %1229 = vmatpush.xpose.msk.msra.mxu3 %vm230_vm0, %v1664_v35 }
 0x3b0   : > { %1157 = vmatpush.xpose.msk.msrb.mxu0 %vm230_vm0, %v1662_v34  ;;  %1230 = vmatpush.xpose.msk.msrb.mxu1 %vm230_vm0, %v1662_v34 }
 0x3b1   : > { %1231 = vmatpush.xpose.msk.msra.mxu2 %vm230_vm0, %v1662_v34  ;;  %1232 = vmatpush.xpose.msk.msra.mxu3 %vm230_vm0, %v1662_v34 }
 0x3b3   : > { %1158 = vmatmul.msk.f32.vlgmr.msrb.gmra.mxu0 %vm230_vm0, %v1662_v34  ;;  %1171 = vmatmul.msk.f32.vlgmr.msrb.gmra.mxu1 %vm230_vm0, %v1688_v51 }
 0x3b4   : > { %1172 = vmatmul.msk.f32.vlgmr.msra.gmra.mxu2 %vm230_vm0, %v1690_v52  ;;  %1173 = vmatmul.msk.f32.vlgmr.msra.gmra.mxu3 %vm230_vm0, %v1692_v53 }
 0x3bb   : > { %1159 = vmatmul.msk.f32.gmra.mxu0 %vm230_vm0, %v1664_v35 }
 0x3c3   : > { %1160 = vmatmul.msk.f32.gmra.mxu0 %vm230_vm0, %v1666_v36 }
 0x3cb   : > { %1161 = vmatmul.msk.f32.gmra.mxu0 %vm230_vm0, %v1668_v37 }
 0x3d3   : > { %1162 = vmatmul.msk.f32.gmra.mxu0 %vm230_vm0, %v1670_v38 }
 0x3db   : > { %1163 = vmatmul.msk.f32.gmra.mxu0 %vm230_vm0, %v1672_v39 }
 0x3e3   : > { %1164 = vmatmul.msk.f32.gmra.mxu0 %vm230_vm0, %v1674_v40 }
 0x3eb   : > { %1165 = vmatmul.msk.f32.gmra.mxu0 %vm230_vm0, %v1676_v41 }
 0x3f3   : > { %1166 = vmatmul.msk.f32.gmra.mxu0 %vm230_vm0, %v1678_v42 }
 0x3fb   : > { %1167 = vmatmul.msk.f32.gmra.mxu0 %vm230_vm0, %v1680_v44 }
 0x403   : > { %1168 = vmatmul.msk.f32.gmra.mxu0 %vm230_vm0, %v1682_v46 }
 0x40b   : > { %1169 = vmatmul.msk.f32.gmra.mxu0 %vm230_vm0, %v1684_v48 }
 0x413   : > { %1170 = vmatmul.msk.f32.gmra.mxu0 %vm230_vm0, %v1686_v50 }
 0x430   : > { %v673_v54 = vpop.f32.mrf.mxu0  ;;  %v712_v55 = vpop.f32.mrf.mxu1 }
 0x431   : > { %v721_v56 = vsub.f32 0.0, %v673_v54  ;;  %v734_v57 = vsub.f32 0.0, %v712_v55 }
 0x433   : > { %v737_v58 = vmul.f32 1.442695, %v721_v56  ;;  %v763_v59 = vmul.f32 1.442695, %v734_v57 }
 0x435   : > { %1274 = vpow2.f32 %v737_v58 }
 0x436   : > { %1276 = vpow2.f32 %v763_v59 }
 0x437   : > { %v715_v60 = vpop.f32.mrf.mxu2  ;;  %v718_v61 = vpop.f32.mrf.mxu3 }
 0x438   : > { %v735_v62 = vsub.f32 0.0, %v715_v60  ;;  %v736_v63 = vsub.f32 0.0, %v718_v61  ;;  %v676_v0 = vpop.f32.mrf.mxu0 }
 0x439   : > { %v722_v1 = vsub.f32 0.0, %v676_v0 }
 0x43a   : > { %v765_v2 = vmul.f32 1.442695, %v735_v62  ;;  %v767_v3 = vmul.f32 1.442695, %v736_v63 }
 0x43b   : > { %v1275_v4 = vpop.eup %1274  ;;  %v739_v7 = vmul.f32 1.442695, %v722_v1 }
 0x43c   : > { %v1277_v5 = vpop.eup %1276  ;;  %v769_v6 = vadd.f32 1.0, %v1275_v4  ;;  %1278 = vpow2.f32 %v765_v2 }
 0x43d   : > { %v782_v8 = vadd.f32 1.0, %v1277_v5  ;;  %1280 = vpow2.f32 %v767_v3 }
 0x43e   : > { %1282 = vrcp.f32 %v769_v6  ;;  %v794_v22 = vand.u32 2147483647, %v769_v6  ;;  %v796_v23 = vand.u32 2147483648, %v769_v6  ;;  %vm790_vm2 = vweird.f32 %v769_v6 }
 0x43f   : > { %1284 = vrcp.f32 %v782_v8  ;;  %v976_v25 = vand.u32 2147483647, %v782_v8  ;;  %v978_v26 = vand.u32 2147483648, %v782_v8  ;;  %vm972_vm4 = vweird.f32 %v782_v8 }
 0x440   : > { %1286 = vpow2.f32 %v739_v7  ;;  %v679_v9 = vpop.f32.mrf.mxu0  ;;  %vm795_vm6 = vcmp.eq.f32.partialorder %v794_v22, 8.507059e+37  ;;  %v797_v43 = vor.u32 1.1754944e-38, %v796_v23 }
 0x441   : > { %v723_v10 = vsub.f32 0.0, %v679_v9  ;;  %vm1867_vm8 = vcmp.eq.f32.partialorder %v976_v25, 8.507059e+37  ;;  %v979_v49 = vor.u32 1.1754944e-38, %v978_v26 }
 0x442   : > { %v1279_v11 = vpop.eup %1278 }
 0x443   : > { %v1281_v12 = vpop.eup %1280  ;;  %v1854_v13 = vadd.f32 1.0, %v1279_v11  ;;  %v741_v18 = vmul.f32 1.442695, %v723_v10 }
 0x444   : > { %v1283_v14 = vpop.eup %1282  ;;  %v1856_v15 = vadd.f32 1.0, %v1281_v12 }
 0x445   : > { %v1285_v16 = vpop.eup %1284  ;;  %v786_v17 = vmul.f32 %v1283_v14, %v769_v6  ;;  %1288 = vrcp.f32 %v1854_v13  ;;  %vm791_vm3 = vweird.f32 %v1283_v14  ;;  %v990_v37 = vand.u32 2147483647, %v1854_v13 }
 0x446   : > { %v1287_v19 = vpop.eup %1286  ;;  %v968_v20 = vmul.f32 %v1285_v16, %v782_v8  ;;  %1290 = vrcp.f32 %v1856_v15  ;;  %vm973_vm5 = vweird.f32 %v1285_v16  ;;  %vm792_vm7 = vmor %vm790_vm2, %vm791_vm3  ;;  %v992_v38 = vand.u32 2147483648, %v1854_v13 }
 0x447   : > { %v787_v21 = vsub.f32 1.0, %v786_v17  ;;  %v1863_v29 = vadd.f32 1.0, %v1287_v19  ;;  %1292 = vpow2.f32 %v741_v18  ;;  %vm974_vm9 = vmor %vm972_vm4, %vm973_vm5  ;;  %v1004_v50 = vand.u32 2147483647, %v1856_v15 }
 0x448   : > { %v969_v24 = vsub.f32 1.0, %v968_v20  ;;  %v682_v27 = vpop.f32.mrf.mxu0  ;;  %v1006_v51 = vand.u32 2147483648, %v1856_v15  ;;  %vm986_vm11 = vweird.f32 %v1854_v13  ;;  %vm1887_vm12 = vcmp.eq.f32.partialorder %v990_v37, 8.507059e+37 }
 0x449   : > { %v788_v28 = vmul.f32 %v1283_v14, %v787_v21  ;;  %v724_v31 = vsub.f32 0.0, %v682_v27  ;;  %1294 = vrcp.f32 %v1863_v29  ;;  %vm1000_vm13 = vweird.f32 %v1856_v15 }
 0x44a   : > { %v970_v30 = vmul.f32 %v1285_v16, %v969_v24  ;;  %v993_v62 = vor.u32 1.1754944e-38, %v992_v38  ;;  %vm1893_vm0 = vcmp.eq.f32.partialorder %v1004_v50, 8.507059e+37  ;;  %v1007_v0 = vor.u32 1.1754944e-38, %v1006_v51 }
 0x44b   : > { %v1289_v32 = vpop.eup %1288  ;;  %v789_v33 = vadd.f32 %v1283_v14, %v788_v28  ;;  %v743_v39 = vmul.f32 1.442695, %v724_v31  ;;  %v808_v7 = vand.u32 2147483647, %v1863_v29  ;;  %v810_v8 = vand.u32 2147483648, %v1863_v29 }
 0x44c   : > { %v971_v45 = vadd.f32 %v1285_v16, %v970_v30  ;;  %v982_v34 = vmul.f32 %v1289_v32, %v1854_v13  ;;  %v1291_v35 = vpop.eup %1290  ;;  %vm987_vm10 = vweird.f32 %v1289_v32  ;;  %vm804_vm3 = vweird.f32 %v1863_v29 }
 0x44d   : > { %v793_v36 = vsel %vm792_vm7, %v1283_v14, %v789_v33  ;;  %v996_v44 = vmul.f32 %v1291_v35, %v1856_v15  ;;  %v1293_v46 = vpop.eup %1292  ;;  %1296 = vpow2.f32 %v743_v39  ;;  %vm1001_vm14 = vweird.f32 %v1291_v35  ;;  %vm988_vm15 = vmor %vm986_vm11, %vm987_vm10 }
 0x44e   : > { %v798_v40 = vsel %vm795_vm6, %v797_v43, %v793_v36  ;;  %v975_v41 = vsel %vm974_vm9, %v1285_v16, %v971_v45  ;;  %v983_v42 = vsub.f32 1.0, %v982_v34  ;;  %v1884_v54 = vadd.f32 1.0, %v1293_v46  ;;  %vm1002_vm1 = vmor %vm1000_vm13, %vm1001_vm14 }
 0x44f   : > { %1009 = vst [vmem:[%s1876_s27] sm:$0xff] %v798_v40  ;;  %v980_v48 = vsel %vm1867_vm8, %v979_v49, %v975_v41  ;;  %v997_v53 = vsub.f32 1.0, %v996_v44  ;;  %v1295_v56 = vpop.eup %1294  ;;  %v811_v16 = vor.u32 1.1754944e-38, %v810_v8  ;;  %vm809_vm5 = vcmp.eq.f32.partialorder %v808_v7, 8.507059e+37 }
 0x450   : > { %1022 = vst [vmem:[%s1876_s27 + $0x68] sm:$0xff] %v980_v48  ;;  %v984_v52 = vmul.f32 %v1289_v32, %v983_v42  ;;  %v685_v55 = vpop.f32.mrf.mxu0  ;;  %v800_v61 = vmul.f32 %v1295_v56, %v1863_v29  ;;  %1298 = vrcp.f32 %v1884_v54  ;;  %vm805_vm2 = vweird.f32 %v1295_v56 }
 0x451   : > { %v725_v58 = vsub.f32 0.0, %v685_v55  ;;  %v998_v60 = vmul.f32 %v1291_v35, %v997_v53  ;;  %vm806_vm4 = vmor %vm804_vm3, %vm805_vm2  ;;  %v824_v24 = vand.u32 2147483648, %v1884_v54  ;;  %v822_v28 = vand.u32 2147483647, %v1884_v54 }
 0x452   : > { %v985_v59 = vadd.f32 %v1289_v32, %v984_v52  ;;  %v801_v3 = vsub.f32 1.0, %v800_v61  ;;  %vm818_vm7 = vweird.f32 %v1884_v54 }
 0x453   : > { %v999_v2 = vadd.f32 %v1291_v35, %v998_v60  ;;  %v745_v4 = vmul.f32 1.442695, %v725_v58  ;;  %v1297_v5 = vpop.eup %1296  ;;  %vm823_vm9 = vcmp.eq.f32.partialorder %v822_v28, 8.507059e+37 }
 0x454   : > { %v989_v1 = vsel %vm988_vm15, %v1289_v32, %v985_v59  ;;  %v802_v10 = vmul.f32 %v1295_v56, %v801_v3  ;;  %v772_v11 = vadd.f32 1.0, %v1297_v5  ;;  %v825_v32 = vor.u32 1.1754944e-38, %v824_v24 }
 0x455   : > { %v994_v6 = vsel %vm1887_vm12, %v993_v62, %v989_v1  ;;  %v1003_v9 = vsel %vm1002_vm1, %v1291_v35, %v999_v2  ;;  %1300 = vpow2.f32 %v745_v4 }
 0x456   : > { %1023 = vst [vmem:[%s1876_s27 + $0x70] sm:$0xff] %v994_v6  ;;  %v1008_v12 = vsel %vm1893_vm0, %v1007_v0, %v1003_v9  ;;  %v803_v13 = vadd.f32 %v1295_v56, %v802_v10  ;;  %1302 = vrcp.f32 %v772_v11  ;;  %v1299_v15 = vpop.eup %1298  ;;  %v836_v47 = vand.u32 2147483647, %v772_v11 }
 0x457   : > { %1024 = vst [vmem:[%s1876_s27 + $0x78] sm:$0xff] %v1008_v12  ;;  %v814_v19 = vmul.f32 %v1299_v15, %v1884_v54  ;;  %vm819_vm6 = vweird.f32 %v1299_v15  ;;  %v838_v49 = vand.u32 2147483648, %v772_v11  ;;  %vm832_vm11 = vweird.f32 %v772_v11 }
 0x458   : > { %v688_v14 = vpop.f32.mrf.mxu0  ;;  %v807_v18 = vsel %vm806_vm4, %v1295_v56, %v803_v13  ;;  %vm820_vm8 = vmor %vm818_vm7, %vm819_vm6  ;;  %vm837_vm13 = vcmp.eq.f32.partialorder %v836_v47, 8.507059e+37 }
 0x459   : > { %v726_v17 = vsub.f32 0.0, %v688_v14  ;;  %v812_v20 = vsel %vm809_vm5, %v811_v16, %v807_v18  ;;  %v815_v23 = vsub.f32 1.0, %v814_v19  ;;  %v839_v41 = vor.u32 1.1754944e-38, %v838_v49 }
 0x45a   : > { %1010 = vst [vmem:[%s1876_s27 + $0x8] sm:$0xff] %v812_v20 }
 0x45b   : > { %v747_v21 = vmul.f32 1.442695, %v726_v17  ;;  %v1301_v22 = vpop.eup %1300  ;;  %v816_v27 = vmul.f32 %v1299_v15, %v815_v23 }
 0x45c   : > { %v773_v25 = vadd.f32 1.0, %v1301_v22  ;;  %v1303_v26 = vpop.eup %1302 }
 0x45d   : > { %1304 = vpow2.f32 %v747_v21  ;;  %v828_v29 = vmul.f32 %v1303_v26, %v772_v11  ;;  %v817_v30 = vadd.f32 %v1299_v15, %v816_v27  ;;  %vm833_vm10 = vweird.f32 %v1303_v26 }
 0x45e   : > { %1306 = vrcp.f32 %v773_v25  ;;  %vm834_vm12 = vmor %vm832_vm11, %vm833_vm10  ;;  %v852_v51 = vand.u32 2147483648, %v773_v25  ;;  %v850_v54 = vand.u32 2147483647, %v773_v25  ;;  %vm846_vm15 = vweird.f32 %v773_v25 }
 0x45f   : > { %v829_v33 = vsub.f32 1.0, %v828_v29  ;;  %v821_v45 = vsel %vm820_vm8, %v1299_v15, %v817_v30 }
 0x460   : > { %v691_v31 = vpop.f32.mrf.mxu0  ;;  %v826_v35 = vsel %vm823_vm9, %v825_v32, %v821_v45  ;;  %v853_v60 = vor.u32 1.1754944e-38, %v852_v51  ;;  %vm851_vm1 = vcmp.eq.f32.partialorder %v850_v54, 8.507059e+37 }
 0x461   : > { %v727_v43 = vsub.f32 0.0, %v691_v31  ;;  %v830_v36 = vmul.f32 %v1303_v26, %v829_v33  ;;  %1011 = vst [vmem:[%s1876_s27 + $0x10] sm:$0xff] %v826_v35 }
 0x463   : > { %v1305_v34 = vpop.eup %1304  ;;  %v749_v37 = vmul.f32 1.442695, %v727_v43  ;;  %v831_v40 = vadd.f32 %v1303_v26, %v830_v36 }
 0x464   : > { %v774_v38 = vadd.f32 1.0, %v1305_v34  ;;  %v1307_v39 = vpop.eup %1306 }
 0x465   : > { %1308 = vpow2.f32 %v749_v37  ;;  %v842_v42 = vmul.f32 %v1307_v39, %v773_v25  ;;  %v835_v44 = vsel %vm834_vm12, %v1303_v26, %v831_v40  ;;  %vm847_vm14 = vweird.f32 %v1307_v39 }
 0x466   : > { %1310 = vrcp.f32 %v774_v38  ;;  %v840_v46 = vsel %vm837_vm13, %v839_v41, %v835_v44  ;;  %vm848_vm0 = vmor %vm846_vm15, %vm847_vm14  ;;  %v866_v1 = vand.u32 2147483648, %v774_v38  ;;  %v864_v4 = vand.u32 2147483647, %v774_v38 }
 0x467   : > { %v843_v48 = vsub.f32 1.0, %v842_v42  ;;  %1012 = vst [vmem:[%s1876_s27 + $0x18] sm:$0xff] %v840_v46  ;;  %vm860_vm3 = vweird.f32 %v774_v38 }
 0x468   : > { %v694_v50 = vpop.f32.mrf.mxu0  ;;  %v867_v10 = vor.u32 1.1754944e-38, %v866_v1  ;;  %vm865_vm5 = vcmp.eq.f32.partialorder %v864_v4, 8.507059e+37 }
 0x469   : > { %v728_v52 = vsub.f32 0.0, %v694_v50  ;;  %v844_v53 = vmul.f32 %v1307_v39, %v843_v48 }
 0x46b   : > { %v1309_v55 = vpop.eup %1308  ;;  %v751_v56 = vmul.f32 1.442695, %v728_v52  ;;  %v845_v58 = vadd.f32 %v1307_v39, %v844_v53 }
 0x46c   : > { %v1311_v57 = vpop.eup %1310  ;;  %v775_v59 = vadd.f32 1.0, %v1309_v55 }
 0x46d   : > { %v856_v61 = vmul.f32 %v1311_v57, %v774_v38  ;;  %1312 = vpow2.f32 %v751_v56  ;;  %v849_v62 = vsel %vm848_vm0, %v1307_v39, %v845_v58  ;;  %vm861_vm2 = vweird.f32 %v1311_v57 }
 0x46e   : > { %1314 = vrcp.f32 %v775_v59  ;;  %v854_v63 = vsel %vm851_vm1, %v853_v60, %v849_v62  ;;  %vm862_vm4 = vmor %vm860_vm3, %vm861_vm2  ;;  %v880_v16 = vand.u32 2147483648, %v775_v59  ;;  %v878_v19 = vand.u32 2147483647, %v775_v59 }
 0x46f   : > { %v857_v0 = vsub.f32 1.0, %v856_v61  ;;  %1013 = vst [vmem:[%s1876_s27 + $0x20] sm:$0xff] %v854_v63  ;;  %vm874_vm7 = vweird.f32 %v775_v59 }
 0x470   : > { %v697_v2 = vpop.f32.mrf.mxu0  ;;  %v881_v25 = vor.u32 1.1754944e-38, %v880_v16  ;;  %vm879_vm9 = vcmp.eq.f32.partialorder %v878_v19, 8.507059e+37 }
 0x471   : > { %v858_v3 = vmul.f32 %v1311_v57, %v857_v0  ;;  %v729_v5 = vsub.f32 0.0, %v697_v2 }
 0x473   : > { %v1313_v6 = vpop.eup %1312  ;;  %v859_v7 = vadd.f32 %v1311_v57, %v858_v3  ;;  %v753_v8 = vmul.f32 1.442695, %v729_v5 }
 0x474   : > { %v1315_v9 = vpop.eup %1314  ;;  %v776_v11 = vadd.f32 1.0, %v1313_v6 }
 0x475   : > { %v863_v12 = vsel %vm862_vm4, %v1311_v57, %v859_v7  ;;  %v870_v13 = vmul.f32 %v1315_v9, %v775_v59  ;;  %1316 = vpow2.f32 %v753_v8  ;;  %vm875_vm6 = vweird.f32 %v1315_v9 }
 0x476   : > { %v868_v14 = vsel %vm865_vm5, %v867_v10, %v863_v12  ;;  %1318 = vrcp.f32 %v776_v11  ;;  %vm876_vm8 = vmor %vm874_vm7, %vm875_vm6  ;;  %v894_v31 = vand.u32 2147483648, %v776_v11  ;;  %v892_v43 = vand.u32 2147483647, %v776_v11 }
 0x477   : > { %1014 = vst [vmem:[%s1876_s27 + $0x28] sm:$0xff] %v868_v14  ;;  %v871_v15 = vsub.f32 1.0, %v870_v13  ;;  %vm888_vm11 = vweird.f32 %v776_v11 }
 0x478   : > { %v700_v17 = vpop.f32.mrf.mxu0  ;;  %v895_v36 = vor.u32 1.1754944e-38, %v894_v31  ;;  %vm893_vm13 = vcmp.eq.f32.partialorder %v892_v43, 8.507059e+37 }
 0x479   : > { %v872_v18 = vmul.f32 %v1315_v9, %v871_v15  ;;  %v730_v20 = vsub.f32 0.0, %v700_v17 }
 0x47b   : > { %v1317_v21 = vpop.eup %1316  ;;  %v873_v22 = vadd.f32 %v1315_v9, %v872_v18  ;;  %v755_v23 = vmul.f32 1.442695, %v730_v20 }
 0x47c   : > { %v1319_v24 = vpop.eup %1318  ;;  %v777_v26 = vadd.f32 1.0, %v1317_v21 }
 0x47d   : > { %v877_v27 = vsel %vm876_vm8, %v1315_v9, %v873_v22  ;;  %v884_v28 = vmul.f32 %v1319_v24, %v776_v11  ;;  %1320 = vpow2.f32 %v755_v23  ;;  %vm889_vm10 = vweird.f32 %v1319_v24 }
 0x47e   : > { %v882_v29 = vsel %vm879_vm9, %v881_v25, %v877_v27  ;;  %1322 = vrcp.f32 %v777_v26  ;;  %vm890_vm12 = vmor %vm888_vm11, %vm889_vm10  ;;  %v908_v42 = vand.u32 2147483648, %v777_v26  ;;  %v906_v48 = vand.u32 2147483647, %v777_v26 }
 0x47f   : > { %1015 = vst [vmem:[%s1876_s27 + $0x30] sm:$0xff] %v882_v29  ;;  %v885_v30 = vsub.f32 1.0, %v884_v28  ;;  %vm902_vm15 = vweird.f32 %v777_v26 }
 0x480   : > { %v703_v32 = vpop.f32.mrf.mxu0  ;;  %v909_v55 = vor.u32 1.1754944e-38, %v908_v42  ;;  %vm907_vm1 = vcmp.eq.f32.partialorder %v906_v48, 8.507059e+37 }
 0x481   : > { %v886_v33 = vmul.f32 %v1319_v24, %v885_v30  ;;  %v731_v45 = vsub.f32 0.0, %v703_v32 }
 0x483   : > { %v1321_v47 = vpop.eup %1320  ;;  %v887_v49 = vadd.f32 %v1319_v24, %v886_v33  ;;  %v757_v34 = vmul.f32 1.442695, %v731_v45 }
 0x484   : > { %v1323_v35 = vpop.eup %1322  ;;  %v778_v37 = vadd.f32 1.0, %v1321_v47 }
 0x485   : > { %v891_v38 = vsel %vm890_vm12, %v1319_v24, %v887_v49  ;;  %v898_v39 = vmul.f32 %v1323_v35, %v777_v26  ;;  %1324 = vpow2.f32 %v757_v34  ;;  %vm903_vm14 = vweird.f32 %v1323_v35 }
 0x486   : > { %v896_v40 = vsel %vm893_vm13, %v895_v36, %v891_v38  ;;  %1326 = vrcp.f32 %v778_v37  ;;  %vm904_vm0 = vmor %vm902_vm15, %vm903_vm14  ;;  %v922_v61 = vand.u32 2147483648, %v778_v37  ;;  %v920_v0 = vand.u32 2147483647, %v778_v37 }
 0x487   : > { %1016 = vst [vmem:[%s1876_s27 + $0x38] sm:$0xff] %v896_v40  ;;  %v899_v41 = vsub.f32 1.0, %v898_v39  ;;  %vm916_vm3 = vweird.f32 %v778_v37 }
 0x488   : > { %v706_v44 = vpop.f32.mrf.mxu0  ;;  %v923_v6 = vor.u32 1.1754944e-38, %v922_v61  ;;  %vm921_vm5 = vcmp.eq.f32.partialorder %v920_v0, 8.507059e+37 }
 0x489   : > { %v900_v46 = vmul.f32 %v1323_v35, %v899_v41  ;;  %v732_v50 = vsub.f32 0.0, %v706_v44 }
 0x48b   : > { %v1325_v51 = vpop.eup %1324  ;;  %v901_v52 = vadd.f32 %v1323_v35, %v900_v46  ;;  %v759_v53 = vmul.f32 1.442695, %v732_v50 }
 0x48c   : > { %v1327_v54 = vpop.eup %1326  ;;  %v779_v56 = vadd.f32 1.0, %v1325_v51 }
 0x48d   : > { %v905_v57 = vsel %vm904_vm0, %v1323_v35, %v901_v52  ;;  %v912_v58 = vmul.f32 %v1327_v54, %v778_v37  ;;  %1328 = vpow2.f32 %v759_v53  ;;  %vm917_vm2 = vweird.f32 %v1327_v54 }
 0x48e   : > { %v910_v59 = vsel %vm907_vm1, %v909_v55, %v905_v57  ;;  %1330 = vrcp.f32 %v779_v56  ;;  %vm918_vm4 = vmor %vm916_vm3, %vm917_vm2  ;;  %v936_v12 = vand.u32 2147483648, %v779_v56  ;;  %v934_v14 = vand.u32 2147483647, %v779_v56 }
 0x48f   : > { %1017 = vst [vmem:[%s1876_s27 + $0x40] sm:$0xff] %v910_v59  ;;  %v913_v60 = vsub.f32 1.0, %v912_v58  ;;  %vm930_vm7 = vweird.f32 %v779_v56 }
 0x490   : > { %v709_v62 = vpop.f32.mrf.mxu0  ;;  %v937_v18 = vor.u32 1.1754944e-38, %v936_v12  ;;  %vm935_vm9 = vcmp.eq.f32.partialorder %v934_v14, 8.507059e+37 }
 0x491   : > { %v914_v63 = vmul.f32 %v1327_v54, %v913_v60  ;;  %v733_v1 = vsub.f32 0.0, %v709_v62 }
 0x493   : > { %v1329_v2 = vpop.eup %1328  ;;  %v915_v3 = vadd.f32 %v1327_v54, %v914_v63  ;;  %v761_v4 = vmul.f32 1.442695, %v733_v1 }
 0x494   : > { %v1331_v5 = vpop.eup %1330  ;;  %v780_v7 = vadd.f32 1.0, %v1329_v2 }
 0x495   : > { %v919_v8 = vsel %vm918_vm4, %v1327_v54, %v915_v3  ;;  %v926_v9 = vmul.f32 %v1331_v5, %v779_v56  ;;  %1332 = vpow2.f32 %v761_v4  ;;  %vm931_vm6 = vweird.f32 %v1331_v5 }
 0x496   : > { %v924_v10 = vsel %vm921_vm5, %v923_v6, %v919_v8  ;;  %1334 = vrcp.f32 %v780_v7  ;;  %vm932_vm8 = vmor %vm930_vm7, %vm931_vm6  ;;  %v950_v24 = vand.u32 2147483648, %v780_v7  ;;  %v948_v26 = vand.u32 2147483647, %v780_v7 }
 0x497   : > { %1018 = vst [vmem:[%s1876_s27 + $0x48] sm:$0xff] %v924_v10  ;;  %v927_v11 = vsub.f32 1.0, %v926_v9  ;;  %vm944_vm11 = vweird.f32 %v780_v7 }
 0x498   : > { %v951_v29 = vor.u32 1.1754944e-38, %v950_v24  ;;  %vm949_vm13 = vcmp.eq.f32.partialorder %v948_v26, 8.507059e+37 }
 0x499   : > { %v928_v13 = vmul.f32 %v1331_v5, %v927_v11 }
 0x49b   : > { %v1333_v15 = vpop.eup %1332  ;;  %v929_v16 = vadd.f32 %v1331_v5, %v928_v13 }
 0x49c   : > { %v1335_v17 = vpop.eup %1334  ;;  %v781_v19 = vadd.f32 1.0, %v1333_v15 }
 0x49d   : > { %v933_v20 = vsel %vm932_vm8, %v1331_v5, %v929_v16  ;;  %v940_v21 = vmul.f32 %v1335_v17, %v780_v7  ;;  %vm945_vm10 = vweird.f32 %v1335_v17 }
 0x49e   : > { %v938_v22 = vsel %vm935_vm9, %v937_v18, %v933_v20  ;;  %1336 = vrcp.f32 %v781_v19  ;;  %vm946_vm12 = vmor %vm944_vm11, %vm945_vm10  ;;  %v964_v43 = vand.u32 2147483648, %v781_v19  ;;  %v962_v47 = vand.u32 2147483647, %v781_v19 }
 0x49f   : > { %1019 = vst [vmem:[%s1876_s27 + $0x50] sm:$0xff] %v938_v22  ;;  %v941_v23 = vsub.f32 1.0, %v940_v21  ;;  %vm958_vm15 = vweird.f32 %v781_v19 }
 0x4a0   : > { %v965_v34 = vor.u32 1.1754944e-38, %v964_v43  ;;  %vm963_vm1 = vcmp.eq.f32.partialorder %v962_v47, 8.507059e+37 }
 0x4a1   : > { %v942_v25 = vmul.f32 %v1335_v17, %v941_v23 }
 0x4a3   : > { %v943_v27 = vadd.f32 %v1335_v17, %v942_v25 }
 0x4a4   : > { %v1337_v28 = vpop.eup %1336 }
 0x4a5   : > { %v947_v30 = vsel %vm946_vm12, %v1335_v17, %v943_v27  ;;  %v954_v31 = vmul.f32 %v1337_v28, %v781_v19  ;;  %vm959_vm14 = vweird.f32 %v1337_v28 }
 0x4a6   : > { %v952_v32 = vsel %vm949_vm13, %v951_v29, %v947_v30  ;;  %vm960_vm0 = vmor %vm958_vm15, %vm959_vm14 }
 0x4a7   : > { %1020 = vst [vmem:[%s1876_s27 + $0x58] sm:$0xff] %v952_v32  ;;  %v955_v33 = vsub.f32 1.0, %v954_v31 }
 0x4a9   : > { %v956_v45 = vmul.f32 %v1337_v28, %v955_v33 }
 0x4ab   : > { %v957_v49 = vadd.f32 %v1337_v28, %v956_v45 }
 0x4ad   : > { %v961_v35 = vsel %vm960_vm0, %v1337_v28, %v957_v49 }
 0x4ae   : > { %v966_v36 = vsel %vm963_vm1, %v965_v34, %v961_v35 }
 0x4af   : > { %1021 = vst [vmem:[%s1876_s27 + $0x60] sm:$0xff] %v966_v36 }
 0x4b0   : > { %1365 = shalt.err (!%p1362_p3)
}
 0x4b1   : > { %s1402_s20 = smov 128   ;;  %s1403_s22 = smov 8  }
 0x4b2   : > { %1233 = dma.vmem_to_hbm [thread:$0]  (%p1467_p5), %s1039_s6, 2048, %s1041_s7, %s1026_s19, %s1402_s20, %s1402_s20, %s1403_s22  }
 0x4b3 PF: > { %p1239_p4 = scmp.ge.s32.totalorder %s1400_s18, 2  ;;  %s1055_s23 = sand.u32 1, %s1388_s15  }
 0x4b4   : > { %s1056_s27 = scalar_lea.sflag [#allocation3], %s1055_s23 }
 0x4b5   : > { %p1236_p7 = pnand %p1239_p4, %p1471_p6 }
 0x4b7   : > { %p1237_p8 = pneg %p1236_p7 }
 0x4b9   : > { %1383 = dma.done.wait (%p1237_p8), %s1056_s27, 2048  }
 0x4ba   : > { %1385 = vsyncadd (%p1237_p8), %s1056_s27, 4294965248  ;;  %p14_p9 = scmp.ge.s32.totalorder %s1454_s21, 6   ;;  %s1973_s15 = smov %s1392_s16 }
 0x4bb   : > { %s1974_s16 = smov %s1396_s17  ;;  %s1975_s17 = smov %s1465_s24 }
 0x4bc   : > { %s1976_s18 = smov %s1454_s21  ;;  %16 = sbr.rel (!%p14_p9) target bundleno = 3 (0x3), region = 71 }
 0x4c1   :  { %1062 = vsyncpa [#allocation3], 1 }
 0x4c2   :  { %1064 = vsyncpa [#allocation3 + $0x1], 1 }

</bundles_post_ra>
